<compile_context>
chip_gen: v6e
topology: v6e:2x2x1
jax: 0.10.0
libtpu: 0.0.40
codegen_flags: <defaults>
</compile_context>

<pallas_src>
import jax
import jax.numpy as jnp
from jax import lax
from jax.experimental import pallas as pl
from jax.experimental.pallas import tpu as pltpu

LANES = 128
ROW_ALIGN = 32                    # int8 min tile is (32, 128)
MAX_BLOCK_ROWS = 32768            # 32768 x 128 int8 = 4 MiB per input per grid step
STRIP_ROWS = 2048                 # rows per inner accumulation strip
NUM_CORE_SPLITS = 2               # leading "parallel" grid axis (v7x megacore)
VMEM_LIMIT_BYTES = 48 * 1024 * 1024


def _round_up(x, m):
    return -(-x // m) * m


def _make_specificity_kernel(rows, block_rows, blocks_per_split, strip_rows):
    """Build the kernel for one static (rows, block_rows, blocks_per_split, strip) config."""
    assert block_rows % strip_rows == 0 and strip_rows % 8 == 0
    n_strips = block_rows // strip_rows
    # Fully unroll short strip loops (LLO visibility); keep long ones rolled to
    # bound instruction-memory / compile time.
    unroll = n_strips if n_strips <= 4 else 1

    def kernel(yt_ref, yp_ref, pos_ref, uni_ref):
        # yt_ref, yp_ref : (block_rows, 128) int8 label blocks
        # pos_ref, uni_ref: (8, 128) int32 resident accumulators (one row per core-split)
        c = pl.program_id(0)
        i = pl.program_id(1)

        @pl.when(i == 0)
        def _init():
            pos_ref[...] = jnp.zeros_like(pos_ref)
            uni_ref[...] = jnp.zeros_like(uni_ref)

        # Logical (unclamped) start row of this block: rows >= `valid` inside the
        # block are not real data (ragged tail / empty core-split).
        start_row = (c * blocks_per_split + i) * block_rows
        valid = jnp.clip(rows - start_row, 0, block_rows)

        def accumulate(masked):
            def strip_body(s, carry):
                pos_acc, uni_acc = carry
                off = pl.multiple_of(s * strip_rows, strip_rows)
                yt = yt_ref[pl.ds(off, strip_rows), :]
                yp = yp_ref[pl.ds(off, strip_rows), :]
                if masked:
                    # Rare path (at most one block per split): widen first so all
                    # masks live at int32 granularity, and force non-real rows to
                    # "positive" so they cancel in the (covered - sum) epilogue.
                    yt32 = yt.astype(jnp.int32)
                    yp32 = yp.astype(jnp.int32)
                    ridx = lax.broadcasted_iota(jnp.int32, (strip_rows, LANES), 0) + off
                    invalid = ridx >= valid
                    pos_b = jnp.logical_or(yt32 != 0, invalid)
                    uni_b = jnp.logical_or(pos_b, yp32 != 0)
                    pos_i = pos_b.astype(jnp.int32)
                    uni_i = uni_b.astype(jnp.int32)
                else:
                    # Fast path: stay in packed int8.  (a | b) == 0  <=>  a == 0 and b == 0,
                    # so the union preserves "nonzero == positive" semantics exactly.
                    pos8 = (yt != 0).astype(jnp.int8)
                    uni8 = ((yt | yp) != 0).astype(jnp.int8)
                    pos_i = pos8.astype(jnp.int32)
                    uni_i = uni8.astype(jnp.int32)
                # Sublane-group partial sums only (vreg-wise VPU adds); the single
                # cross-lane reduction happens once, outside the kernel.
                pos_p = pos_i.reshape(strip_rows // 8, 8, LANES).sum(axis=0)
                uni_p = uni_i.reshape(strip_rows // 8, 8, LANES).sum(axis=0)
                return pos_acc + pos_p, uni_acc + uni_p

            zero = jnp.zeros((8, LANES), jnp.int32)
            pos_tot, uni_tot = lax.fori_loop(0, n_strips, strip_body, (zero, zero),
                                             unroll=unroll)
            pos_ref[...] += pos_tot
            uni_ref[...] += uni_tot

        # Common case: whole block is real data -> zero masking overhead.
        @pl.when(valid == block_rows)
        def _full():
            accumulate(masked=False)

        # Ragged tail / empty core-split block.
        @pl.when(valid < block_rows)
        def _partial():
            accumulate(masked=True)

    return kernel


def specificity(y_true, y_pred):
    """Specificity = TN / (TN + FP) for binary label vectors (nonzero == positive)."""
    assert y_true.size == y_pred.size, "y_true / y_pred size mismatch"
    n = int(y_true.size)
    if n == 0:
        return jnp.float32(jnp.nan)

    yt = y_true.reshape(-1)
    yp = y_pred.reshape(-1)
    # Keep labels int8 end-to-end (4x less HBM traffic than int32); only cast if
    # the caller handed us another dtype.  (Cast truncates mod 256 -- fine for
    # hard 0/1 labels.)
    if yt.dtype != jnp.int8:
        yt = yt.astype(jnp.int8)
    if yp.dtype != jnp.int8:
        yp = yp.astype(jnp.int8)

    # The kernel only needs a free (rows, 128) 2-D view: that requires n to be a
    # multiple of 128 and at least ROW_ALIGN rows (int8 tiling).  All block-level
    # raggedness is handled by in-kernel masking, so the old
    # "pad to NUM_SPLITS * block_rows * 128" full-array copy is gone.
    n_pad = max(_round_up(n, LANES), ROW_ALIGN * LANES)
    pad = n_pad - n
    if pad:
        # Only when n % 128 != 0 (or n < 4096).  Pad with "positive" labels; the
        # (covered - sum) accounting cancels them exactly.
        yt = jnp.pad(yt, (0, pad), constant_values=1)
        yp = jnp.pad(yp, (0, pad), constant_values=1)

    rows = n_pad // LANES
    yt2 = yt.reshape(rows, LANES)      # contiguous reshape: bitcast, no copy
    yp2 = yp.reshape(rows, LANES)

    per_split = pl.cdiv(rows, NUM_CORE_SPLITS)
    if per_split >= STRIP_ROWS:
        block_rows = min(MAX_BLOCK_ROWS, _round_up(per_split, STRIP_ROWS))
        strip_rows = STRIP_ROWS
    else:
        block_rows = _round_up(per_split, ROW_ALIGN)
        strip_rows = block_rows
    blocks_per_split = pl.cdiv(per_split, block_rows)

    # Blocks that start past the real data re-read the last real block (their
    # contribution is fully masked away in the kernel), avoiding fully-OOB DMAs.
    last_block = pl.cdiv(rows, block_rows) - 1

    def in_map(c, i):
        return (jnp.minimum(c * blocks_per_split + i, last_block), 0)

    def out_map(c, i):
        return (c, 0, 0)

    kernel = _make_specificity_kernel(rows, block_rows, blocks_per_split, strip_rows)

    pos_parts, uni_parts = pl.pallas_call(
        kernel,
        out_shape=(
            jax.ShapeDtypeStruct((NUM_CORE_SPLITS, 8, LANES), jnp.int32),
            jax.ShapeDtypeStruct((NUM_CORE_SPLITS, 8, LANES), jnp.int32),
        ),
        grid_spec=pltpu.PrefetchScalarGridSpec(
            num_scalar_prefetch=0,
            grid=(NUM_CORE_SPLITS, blocks_per_split),
            in_specs=[
                pl.BlockSpec((block_rows, LANES), in_map),
                pl.BlockSpec((block_rows, LANES), in_map),
            ],
            out_specs=[
                pl.BlockSpec((None, 8, LANES), out_map),
                pl.BlockSpec((None, 8, LANES), out_map),
            ],
        ),
        compiler_params=pltpu.CompilerParams(
            dimension_semantics=("parallel", "arbitrary"),
            vmem_limit_bytes=VMEM_LIMIT_BYTES,
        ),
    )(yt2, yp2)

    # Every covered element contributed either its real value or a forced
    # "positive", so the counts below are exact in int32 (assumes n < 2^31):
    #   NEG = covered - S_pos  (== TN + FP),   TN = covered - S_union
    covered = NUM_CORE_SPLITS * blocks_per_split * block_rows * LANES
    s_pos = jnp.sum(pos_parts)
    s_uni = jnp.sum(uni_parts)
    tn = (covered - s_uni).astype(jnp.float32)
    neg = (covered - s_pos).astype(jnp.float32)
    # Matches the reference semantics: 0/0 -> NaN when there are no negatives.
    return tn / neg


if __name__ == "__main__":
    key = jax.random.PRNGKey(0)

    # n = 2000  : ragged (n % 128 != 0), tiny -> lane pad + clamped empty split block
    # n = 8192  : 128-aligned, zero-copy path, all blocks full
    # n = 655360: 128-aligned, zero-copy, multi-strip inner loop + masked tail block
    for n in (2000, 8192, 655360):
        k1, k2 = jax.random.split(jax.random.fold_in(key, n))
        y_true = jax.random.bernoulli(k1, p=0.5, shape=(n,)).astype(jnp.int8)
        y_pred = jax.random.bernoulli(k2, p=0.5, shape=(n,)).astype(jnp.int8)

        spec = specificity(y_true, y_pred)
        jax.block_until_ready(spec)

        # pure-JAX reference (confusion-matrix semantics: tn / (tn + fp))
        gneg = y_true == 0
        tn = jnp.sum((gneg & (y_pred == 0)).astype(jnp.float32))
        fp = jnp.sum((gneg & (y_pred != 0)).astype(jnp.float32))
        ref = tn / (tn + fp)
        assert jnp.allclose(spec, ref, atol=1e-6), (n, spec, ref)

    print("KERNEL_OK")
</pallas_src>

<mosaic_0001>
module attributes {stable_mosaic.version = 11 : i64} {
  func.func @kernel(%arg0: i32, %arg1: i32, %arg2: memref<32x128xi8, #tpu.memory_space<vmem>>, %arg3: memref<32x128xi8, #tpu.memory_space<vmem>>, %arg4: memref<1x8x128xi32, #tpu.memory_space<vmem>>, %arg5: memref<1x8x128xi32, #tpu.memory_space<vmem>>) attributes {dimension_semantics = [#tpu.dimension_semantics<parallel>, #tpu.dimension_semantics<arbitrary>], iteration_bounds = array<i64: 2, 1>, scalar_prefetch = 0 : i64, scratch_operands = 0 : i64, tpu.core_type = #tpu.core_type<tc>, window_params = [{transform_indices = @transform_0, window_bounds = array<i64: 32, 128>}, {transform_indices = @transform_1, window_bounds = array<i64: 32, 128>}, {transform_indices = @transform_2, window_bounds = array<i64: 1, 8, 128>}, {transform_indices = @transform_3, window_bounds = array<i64: 1, 8, 128>}]} {
    %c0_i32 = arith.constant 0 : i32
    %0 = arith.cmpi eq, %arg1, %c0_i32 : i32
    %1 = arith.extui %0 : i1 to i32
    %c0_i32_0 = arith.constant 0 : i32
    %2 = arith.cmpi ne, %1, %c0_i32_0 : i32
    scf.if %2 {
      %c0_i32_8 = arith.constant 0 : i32
      %15 = vector.broadcast %c0_i32_8 : i32 to vector<8x128xi32>
      %c0 = arith.constant 0 : index
      %c0_9 = arith.constant 0 : index
      %c0_10 = arith.constant 0 : index
      %16 = vector.load %arg4[%c0, %c0_9, %c0_10] : memref<1x8x128xi32, #tpu.memory_space<vmem>>, vector<1x8x128xi32>
      %17 = vector.shape_cast %16 : vector<1x8x128xi32> to vector<8x128xi32>
      %18 = vector.shape_cast %15 : vector<8x128xi32> to vector<1x8x128xi32>
      tpu.vector_store %arg4[%c0, %c0_9, %c0_10], %18 {strides = array<i32>} : memref<1x8x128xi32, #tpu.memory_space<vmem>>, vector<1x8x128xi32>,
      %c0_i32_11 = arith.constant 0 : i32
      %19 = vector.broadcast %c0_i32_11 : i32 to vector<8x128xi32>
      %c0_12 = arith.constant 0 : index
      %c0_13 = arith.constant 0 : index
      %c0_14 = arith.constant 0 : index
      %20 = vector.load %arg5[%c0_12, %c0_13, %c0_14] : memref<1x8x128xi32, #tpu.memory_space<vmem>>, vector<1x8x128xi32>
      %21 = vector.shape_cast %20 : vector<1x8x128xi32> to vector<8x128xi32>
      %22 = vector.shape_cast %19 : vector<8x128xi32> to vector<1x8x128xi32>
      tpu.vector_store %arg5[%c0_12, %c0_13, %c0_14], %22 {strides = array<i32>} : memref<1x8x128xi32, #tpu.memory_space<vmem>>, vector<1x8x128xi32>,
    } else {
    }
    %c1_i32 = arith.constant 1 : i32
    %3 = arith.muli %arg0, %c1_i32 : i32
    %4 = arith.addi %3, %arg1 : i32
    %c32_i32 = arith.constant 32 : i32
    %5 = arith.muli %4, %c32_i32 : i32
    %c32_i32_1 = arith.constant 32 : i32
    %6 = arith.subi %c32_i32_1, %5 : i32
    %c0_i32_2 = arith.constant 0 : i32
    %c32_i32_3 = arith.constant 32 : i32
    %7 = arith.maxsi %c0_i32_2, %6 : i32
    %8 = arith.minsi %c32_i32_3, %7 : i32
    %c32_i32_4 = arith.constant 32 : i32
    %9 = arith.cmpi eq, %8, %c32_i32_4 : i32
    %10 = arith.extui %9 : i1 to i32
    %c0_i32_5 = arith.constant 0 : i32
    %11 = arith.cmpi ne, %10, %c0_i32_5 : i32
    scf.if %11 {
      %c0_i32_8 = arith.constant 0 : i32
      %15 = vector.broadcast %c0_i32_8 : i32 to vector<8x128xi32>
      %c0_i32_9 = arith.constant 0 : i32
      %c32_i32_10 = arith.constant 32 : i32
      %16 = arith.muli %c0_i32_9, %c32_i32_10 : i32
      %17 = tpu.assume_multiple %16, 32 : i32
      %18 = arith.index_cast %17 : i32 to index
      %c0 = arith.constant 0 : index
      %19 = vector.load %arg2[%18, %c0] : memref<32x128xi8, #tpu.memory_space<vmem>>, vector<32x128xi8>
      %20 = arith.index_cast %17 : i32 to index
      %c0_11 = arith.constant 0 : index
      %21 = vector.load %arg3[%20, %c0_11] : memref<32x128xi8, #tpu.memory_space<vmem>>, vector<32x128xi8>
      %c0_i8 = arith.constant 0 : i8
      %22 = vector.broadcast %c0_i8 : i8 to vector<32x128xi8>
      %23 = arith.cmpi ne, %19, %22 : vector<32x128xi8>
      %24 = arith.extui %23 : vector<32x128xi1> to vector<32x128xi8>
      %25 = arith.ori %19, %21 : vector<32x128xi8>
      %c0_i8_12 = arith.constant 0 : i8
      %26 = vector.broadcast %c0_i8_12 : i8 to vector<32x128xi8>
      %27 = arith.cmpi ne, %25, %26 : vector<32x128xi8>
      %28 = arith.extui %27 : vector<32x128xi1> to vector<32x128xi8>
      %29 = arith.extsi %24 : vector<32x128xi8> to vector<32x128xi32>
      %30 = arith.extsi %28 : vector<32x128xi8> to vector<32x128xi32>
      %31 = vector.shape_cast %29 : vector<32x128xi32> to vector<4x8x128xi32>
      %cst = arith.constant dense<0> : vector<8x128xi32>
      %32 = vector.multi_reduction <add>, %31, %cst [0] : vector<4x8x128xi32> to vector<8x128xi32>
      %33 = vector.shape_cast %30 : vector<32x128xi32> to vector<4x8x128xi32>
      %cst_13 = arith.constant dense<0> : vector<8x128xi32>
      %34 = vector.multi_reduction <add>, %33, %cst_13 [0] : vector<4x8x128xi32> to vector<8x128xi32>
      %35 = arith.addi %15, %32 : vector<8x128xi32>
      %36 = arith.addi %15, %34 : vector<8x128xi32>
      %c1_i32_14 = arith.constant 1 : i32
      %c0_15 = arith.constant 0 : index
      %c0_16 = arith.constant 0 : index
      %c0_17 = arith.constant 0 : index
      %37 = vector.load %arg4[%c0_15, %c0_16, %c0_17] : memref<1x8x128xi32, #tpu.memory_space<vmem>>, vector<1x8x128xi32>
      %38 = vector.shape_cast %37 : vector<1x8x128xi32> to vector<8x128xi32>
      %39 = arith.addi %38, %35 : vector<8x128xi32>
      %c0_18 = arith.constant 0 : index
      %c0_19 = arith.constant 0 : index
      %c0_20 = arith.constant 0 : index
      %40 = vector.load %arg4[%c0_18, %c0_19, %c0_20] : memref<1x8x128xi32, #tpu.memory_space<vmem>>, vector<1x8x128xi32>
      %41 = vector.shape_cast %40 : vector<1x8x128xi32> to vector<8x128xi32>
      %42 = vector.shape_cast %39 : vector<8x128xi32> to vector<1x8x128xi32>
      tpu.vector_store %arg4[%c0_18, %c0_19, %c0_20], %42 {strides = array<i32>} : memref<1x8x128xi32, #tpu.memory_space<vmem>>, vector<1x8x128xi32>,
      %c0_21 = arith.constant 0 : index
      %c0_22 = arith.constant 0 : index
      %c0_23 = arith.constant 0 : index
      %43 = vector.load %arg5[%c0_21, %c0_22, %c0_23] : memref<1x8x128xi32, #tpu.memory_space<vmem>>, vector<1x8x128xi32>
      %44 = vector.shape_cast %43 : vector<1x8x128xi32> to vector<8x128xi32>
      %45 = arith.addi %44, %36 : vector<8x128xi32>
      %c0_24 = arith.constant 0 : index
      %c0_25 = arith.constant 0 : index
      %c0_26 = arith.constant 0 : index
      %46 = vector.load %arg5[%c0_24, %c0_25, %c0_26] : memref<1x8x128xi32, #tpu.memory_space<vmem>>, vector<1x8x128xi32>
      %47 = vector.shape_cast %46 : vector<1x8x128xi32> to vector<8x128xi32>
      %48 = vector.shape_cast %45 : vector<8x128xi32> to vector<1x8x128xi32>
      tpu.vector_store %arg5[%c0_24, %c0_25, %c0_26], %48 {strides = array<i32>} : memref<1x8x128xi32, #tpu.memory_space<vmem>>, vector<1x8x128xi32>,
    } else {
    }
    %c32_i32_6 = arith.constant 32 : i32
    %12 = arith.cmpi slt, %8, %c32_i32_6 : i32
    %13 = arith.extui %12 : i1 to i32
    %c0_i32_7 = arith.constant 0 : i32
    %14 = arith.cmpi ne, %13, %c0_i32_7 : i32
    scf.if %14 {
      %c0_i32_8 = arith.constant 0 : i32
      %15 = vector.broadcast %c0_i32_8 : i32 to vector<8x128xi32>
      %c0_i32_9 = arith.constant 0 : i32
      %c32_i32_10 = arith.constant 32 : i32
      %16 = arith.muli %c0_i32_9, %c32_i32_10 : i32
      %17 = tpu.assume_multiple %16, 32 : i32
      %18 = arith.index_cast %17 : i32 to index
      %c0 = arith.constant 0 : index
      %19 = vector.load %arg2[%18, %c0] : memref<32x128xi8, #tpu.memory_space<vmem>>, vector<32x128xi8>
      %20 = arith.index_cast %17 : i32 to index
      %c0_11 = arith.constant 0 : index
      %21 = vector.load %arg3[%20, %c0_11] : memref<32x128xi8, #tpu.memory_space<vmem>>, vector<32x128xi8>
      %22 = arith.extsi %19 : vector<32x128xi8> to vector<32x128xi32>
      %23 = arith.extsi %21 : vector<32x128xi8> to vector<32x128xi32>
      %24 = tpu.iota {dimensions = array<i32: 0>} : vector<32x128xi32>
      %25 = vector.broadcast %17 : i32 to vector<32x128xi32>
      %26 = arith.addi %24, %25 : vector<32x128xi32>
      %27 = vector.broadcast %8 : i32 to vector<32x128xi32>
      %28 = arith.cmpi sge, %26, %27 : vector<32x128xi32>
      %c0_i32_12 = arith.constant 0 : i32
      %29 = vector.broadcast %c0_i32_12 : i32 to vector<32x128xi32>
      %30 = arith.cmpi ne, %22, %29 : vector<32x128xi32>
      %31 = arith.ori %30, %28 : vector<32x128xi1>
      %c0_i32_13 = arith.constant 0 : i32
      %32 = vector.broadcast %c0_i32_13 : i32 to vector<32x128xi32>
      %33 = arith.cmpi ne, %23, %32 : vector<32x128xi32>
      %34 = arith.ori %31, %33 : vector<32x128xi1>
      %35 = arith.extui %31 : vector<32x128xi1> to vector<32x128xi32>
      %36 = arith.extui %34 : vector<32x128xi1> to vector<32x128xi32>
      %37 = vector.shape_cast %35 : vector<32x128xi32> to vector<4x8x128xi32>
      %cst = arith.constant dense<0> : vector<8x128xi32>
      %38 = vector.multi_reduction <add>, %37, %cst [0] : vector<4x8x128xi32> to vector<8x128xi32>
      %39 = vector.shape_cast %36 : vector<32x128xi32> to vector<4x8x128xi32>
      %cst_14 = arith.constant dense<0> : vector<8x128xi32>
      %40 = vector.multi_reduction <add>, %39, %cst_14 [0] : vector<4x8x128xi32> to vector<8x128xi32>
      %41 = arith.addi %15, %38 : vector<8x128xi32>
      %42 = arith.addi %15, %40 : vector<8x128xi32>
      %c1_i32_15 = arith.constant 1 : i32
      %c0_16 = arith.constant 0 : index
      %c0_17 = arith.constant 0 : index
      %c0_18 = arith.constant 0 : index
      %43 = vector.load %arg4[%c0_16, %c0_17, %c0_18] : memref<1x8x128xi32, #tpu.memory_space<vmem>>, vector<1x8x128xi32>
      %44 = vector.shape_cast %43 : vector<1x8x128xi32> to vector<8x128xi32>
      %45 = arith.addi %44, %41 : vector<8x128xi32>
      %c0_19 = arith.constant 0 : index
      %c0_20 = arith.constant 0 : index
      %c0_21 = arith.constant 0 : index
      %46 = vector.load %arg4[%c0_19, %c0_20, %c0_21] : memref<1x8x128xi32, #tpu.memory_space<vmem>>, vector<1x8x128xi32>
      %47 = vector.shape_cast %46 : vector<1x8x128xi32> to vector<8x128xi32>
      %48 = vector.shape_cast %45 : vector<8x128xi32> to vector<1x8x128xi32>
      tpu.vector_store %arg4[%c0_19, %c0_20, %c0_21], %48 {strides = array<i32>} : memref<1x8x128xi32, #tpu.memory_space<vmem>>, vector<1x8x128xi32>,
      %c0_22 = arith.constant 0 : index
      %c0_23 = arith.constant 0 : index
      %c0_24 = arith.constant 0 : index
      %49 = vector.load %arg5[%c0_22, %c0_23, %c0_24] : memref<1x8x128xi32, #tpu.memory_space<vmem>>, vector<1x8x128xi32>
      %50 = vector.shape_cast %49 : vector<1x8x128xi32> to vector<8x128xi32>
      %51 = arith.addi %50, %42 : vector<8x128xi32>
      %c0_25 = arith.constant 0 : index
      %c0_26 = arith.constant 0 : index
      %c0_27 = arith.constant 0 : index
      %52 = vector.load %arg5[%c0_25, %c0_26, %c0_27] : memref<1x8x128xi32, #tpu.memory_space<vmem>>, vector<1x8x128xi32>
      %53 = vector.shape_cast %52 : vector<1x8x128xi32> to vector<8x128xi32>
      %54 = vector.shape_cast %51 : vector<8x128xi32> to vector<1x8x128xi32>
      tpu.vector_store %arg5[%c0_25, %c0_26, %c0_27], %54 {strides = array<i32>} : memref<1x8x128xi32, #tpu.memory_space<vmem>>, vector<1x8x128xi32>,
    } else {
    }
    return
  }
  func.func @transform_0(%arg0: i32, %arg1: i32) -> (i32, i32) {
    %c1_i32 = arith.constant 1 : i32
    %0 = arith.muli %arg0, %c1_i32 : i32
    %1 = arith.addi %0, %arg1 : i32
    %c0_i32 = arith.constant 0 : i32
    %2 = arith.minsi %1, %c0_i32 : i32
    %c0_i32_0 = arith.constant 0 : i32
    %c0_i32_1 = arith.constant 0 : i32
    return %2, %c0_i32_0 : i32, i32
  }
  func.func @transform_1(%arg0: i32, %arg1: i32) -> (i32, i32) {
    %c1_i32 = arith.constant 1 : i32
    %0 = arith.muli %arg0, %c1_i32 : i32
    %1 = arith.addi %0, %arg1 : i32
    %c0_i32 = arith.constant 0 : i32
    %2 = arith.minsi %1, %c0_i32 : i32
    %c0_i32_0 = arith.constant 0 : i32
    %c0_i32_1 = arith.constant 0 : i32
    return %2, %c0_i32_0 : i32, i32
  }
  func.func @transform_2(%arg0: i32, %arg1: i32) -> (i32, i32, i32) {
    %c0_i32 = arith.constant 0 : i32
    %c0_i32_0 = arith.constant 0 : i32
    %c0_i32_1 = arith.constant 0 : i32
    return %arg0, %c0_i32, %c0_i32_0 : i32, i32, i32
  }
  func.func @transform_3(%arg0: i32, %arg1: i32) -> (i32, i32, i32) {
    %c0_i32 = arith.constant 0 : i32
    %c0_i32_0 = arith.constant 0 : i32
    %c0_i32_1 = arith.constant 0 : i32
    return %arg0, %c0_i32, %c0_i32_0 : i32, i32, i32
  }
}

</mosaic_0001>

<bundles_post_ra>
// kernel: tpu_custom_call.1
= control target key start
LH: loop header
LB: loop body
LE: loop exit
PB: predicated region body
PF: predicated region fallthrough
CT: control target
= control target key end

     0   :  { %9 = vsyncpa [#allocation3], 0  ;;  %s1246_s0 = inlined_call_operand.hbm [shape: s8[32,128], index: 0, kind: input, shape index: {}]   ;;  %s1247_s1 = inlined_call_operand.hbm [shape: s8[32,128], index: 1, kind: input, shape index: {}]   ;;  %s1248_s2 = inlined_call_operand.hbm [shape: s32[2,8,128], index: 2, kind: output, shape index: {0}]   ;;  %s1249_s3 = inlined_call_operand.hbm [shape: s32[2,8,128], index: 3, kind: output, shape index: {1}]  }
   0x1   :  { %11 = vsyncpa [#allocation3 + $0x1], 0 }
   0x2   :  { %12 = vsyncpa [#allocation6], 0 }
   0x3   :  { %14 = vsyncpa [#allocation6 + $0x1], 0 }
   0x4   :  { %15 = vsyncpa [#allocation4], 0 }
   0x5   :  { %17 = vsyncpa [#allocation4 + $0x1], 0 }
   0x6   :  { %18 = vsyncpa [#allocation9], 0 }
   0x7   :  { %20 = vsyncpa [#allocation9 + $0x1], 0  ;;  %s950_s12 = smov 0   ;;  %s952_s13 = smov 0  }
   0x8   :  { %s954_s14 = smov 0   ;;  %s956_s15 = smov 0  }
   0x9   :  { %s958_s16 = smov 0   ;;  %s960_s17 = smov 0  }
   0xa   :  { %s962_s18 = smov 0   ;;  %s964_s19 = smov 0  }
   0xb LB: > { %s602_s20 = sadd.s32 4294967295, %s921_s19   ;;  %s603_s21 = sadd.s32 4294967294, %s921_s19   ;;  %s921_s19 = sphi %s964_s19, %s26_s19   ;;  %s917_s18 = sphi %s962_s18, %s1282_s18   ;;  %s913_s17 = sphi %s960_s17, %s1281_s17   ;;  %s909_s16 = sphi %s958_s16, %s1236_s16   ;;  %s905_s15 = sphi %s956_s15, %s1280_s15   ;;  %s901_s14 = sphi %s954_s14, %s1279_s14   ;;  %s897_s13 = sphi %s952_s13, %s1278_s13   ;;  %s893_s12 = sphi %s950_s12, %s1277_s12  }
   0xc   : > { %s38_s22 = sadd.s32 1, %s917_s18  ;;  %p890_p1 = scmp.ne.s32.totalorder %s909_s16, 0 }
   0xd   : > { %p40_p0 = scmp.ge.s32.totalorder %s38_s22, 2  ;;  %p59_p2 = scmp.eq.s32.totalorder %s921_s19, 0 }
   0xe   : > { %p64_p3 = scmp.ne.s32.totalorder %s909_s16, %s905_s15  ;;  %p65_p5 = scmp.eq.s32.totalorder %s602_s20, 0 }
   0xf   : > { %s1284_s22 = smov (%p40_p0, %s38_s22), 0  ;;  %p996_p4 = por %p890_p1, %p59_p2 }
  0x10   : > { %p1000_p6 = por %p65_p5, %p64_p3  ;;  %s106_s25 = ssub.s32 %s917_s18, %s1284_s22 }
  0x11   : > { %p107_p7 = scmp.eq.s32.totalorder %s106_s25, 0  ;;  %s109_s26 = sadd.s32 1, %s901_s14 }
  0x12   : > { %s1253_s24 = scalar_select %p1000_p6, 1, 0 }
  0x13   : > { %s1008_s27 = scalar_select %p107_p7, %s901_s14, %s109_s26  }
  0x14   : > { %p119_p8 = scmp.ne.s32.totalorder %s901_s14, %s897_s13  ;;  %p120_p9 = scmp.eq.s32.totalorder %s602_s20, 1 }
  0x15   : > { %p125_p10 = scmp.ne.s32.totalorder %s897_s13, %s893_s12  ;;  %p126_p11 = scmp.eq.s32.totalorder %s603_s21, 1 }
  0x16   : > { %p1014_p12 = por %p120_p9, %p119_p8  ;;  %p653_p1 = scmp.lt.s32.totalorder %s921_s19, 2 }
  0x17   : > { %p1019_p0 = por %p126_p11, %p125_p10  ;;  %s923_s30 = smov [#allocation2]  }
  0x18   : > { %s1254_s28 = scalar_select %p1014_p12, 1, 0 }
  0x19   : > { %s1255_s29 = scalar_select %p1019_p0, 1, 0 }
  0x1a   : > { %s186_s4 = sshll.u32 %s923_s30, 4  ;;  %p1026_p2 = pnand %p653_p1, %p996_p4  ;;  %s187_s4 = int_to_ptr.vmem [resolvable:$true] %s186_s4 }
  0x1b   : > { %s730_s8 = scalar_lea.hbm %s1246_s0, 128 }
  0x1c   : > { %p731_p7 = scmp.ne.s32.totalorder %s1246_s0, %s730_s8  ;;  %p732_p8 = pneg %p1026_p2 }
  0x1d   : > { %p737_p10 = scmp.lt.s32.totalorder %s730_s8, %s730_s8 }
  0x1e   : > { %p733_p4 = pnand %p732_p8, %p731_p7 }
  0x20   : > { %p734_p9 = pneg %p733_p4 }
  0x22   : > { %p739_p11 = pnand %p737_p10, %p734_p9 }
  0x24   : > { %742 = shalt.err (!%p739_p11)
}
  0x25   : > { %s743_s11 = scalar_lea.vmem %s187_s4, 128  ;;  %s750_s15 = scalar_lea.vmem %s187_s4, 256 }
  0x26   : > { %p744_p1 = scmp.ne.s32.totalorder %s187_s4, %s743_s11  ;;  %p751_p5 = scmp.lt.s32.totalorder %s187_s4, %s187_s4 }
  0x27   : > { %p752_p0 = scmp.lt.s32.totalorder %s750_s15, %s743_s11 }
  0x28   : > { %p746_p13 = pnand %p744_p1, %p732_p8 }
  0x29   : > { %p753_p12 = por %p752_p0, %p751_p5 }
  0x2a   : > { %p747_p3 = pneg %p746_p13 }
  0x2c   : > { %p754_p6 = pnand %p753_p12, %p747_p3 }
  0x2e   : > { %757 = shalt.err (!%p754_p6)
}
  0x2f   : > { %642 = dma.hbm_to_vmem [thread:$0]  (!%p1026_p2), %s1246_s0, 128, %s187_s4, [#allocation3]  }
  0x30   : > { %p1257_p7 = scmp.lt.s32.totalorder %s921_s19, 3  ;;  %p1258_p4 = scmp.ge.s32.totalorder %s921_s19, 1 }
  0x31   : > { %s924_s25 = smov [#allocation5]   ;;  %s758_s7 = scalar_lea.hbm %s1247_s1, 128 }
  0x32   : > { %p1055_p9 = pnand %p1258_p4, %p1257_p7  ;;  %s207_s26 = sshll.u32 %s924_s25, 4  ;;  %s208_s26 = int_to_ptr.vmem [resolvable:$true] %s207_s26 }
  0x33   : > { %p759_p6 = scmp.ne.s32.totalorder %s1247_s1, %s758_s7  ;;  %p765_p0 = scmp.lt.s32.totalorder %s758_s7, %s758_s7 }
  0x34   : > { %s1259_s23 = scalar_select %p1055_p9, 1, 0 }
  0x35   : > { %p761_p12 = pnand %p759_p6, %p732_p8 }
  0x37   : > { %p762_p13 = pneg %p761_p12 }
  0x39   : > { %p767_p3 = pnand %p765_p0, %p762_p13 }
  0x3b   : > { %770 = shalt.err (!%p767_p3)
}
  0x3c   : > { %s771_s4 = scalar_lea.vmem %s208_s26, 128  ;;  %s778_s10 = scalar_lea.vmem %s208_s26, 256 }
  0x3d   : > { %p772_p5 = scmp.ne.s32.totalorder %s208_s26, %s771_s4  ;;  %p779_p1 = scmp.lt.s32.totalorder %s208_s26, %s208_s26 }
  0x3e   : > { %p780_p7 = scmp.lt.s32.totalorder %s778_s10, %s771_s4 }
  0x3f   : > { %p774_p10 = pnand %p772_p5, %p732_p8 }
  0x40   : > { %p781_p4 = por %p780_p7, %p779_p1 }
  0x41   : > { %p775_p11 = pneg %p774_p10 }
  0x43   : > { %p782_p9 = pnand %p781_p4, %p775_p11 }
  0x45   : > { %785 = shalt.err (!%p782_p9)
}
  0x46   : > { %645 = dma.hbm_to_vmem [thread:$0]  (!%p1026_p2), %s1247_s1, 128, %s208_s26, [#allocation6]  }
  0x47   : > { %p1260_p6 = scmp.ne.s32.totalorder %s1259_s23, 0 }
  0x48   : > { %s218_s20 = sand.u32 (!%p1260_p6), 1, %s909_s16   ;;  %p1261_p8 = scmp.ne.s32.totalorder (!%p1260_p6), %s1253_s24, 0 }
  0x49   : > { %216 = sbr.rel (%p1260_p6) target bundleno = 201 (0xc9), region = 28  ;;  %s611_s21 = sshll.u32 (!%p1260_p6), %s218_s20, 3 }
  0x4a   : > { %s219_s25 = scalar_lea.sflag (!%p1260_p6), [#allocation3], %s218_s20  ;;  %s1079_s30 = scalar_lea.vmem (!%p1260_p6), [#allocation2], %s611_s21 }
  0x4e   : > { %875 = dma.done.wait (%p1261_p8), %s219_s25, 128  }
  0x4f   : > { %877 = vsyncadd (%p1261_p8), %s219_s25, 4294967168  ;;  %s228_s5 = scalar_lea.sflag [#allocation6], %s218_s20  ;;  %s1085_s6 = scalar_lea.vmem [#allocation5], %s611_s21 }
  0x50   : > { %879 = dma.done.wait (%p1261_p8), %s228_s5, 128  }
  0x51   : > { %881 = vsyncadd (%p1261_p8), %s228_s5, 4294967168  ;;  %s1092_s23 = sand.u32 1, %s897_s13   ;;  %s615_s26 = sshll.u32 %s913_s17, 5  ;;  %v925_v0 = vmov 0  }
  0x52   : > { %s613_s7 = sshll.u32 %s1092_s23, 3  ;;  %s280_s8 = ssub.s32 32, %s615_s26 }
  0x53   : > { %s1096_s9 = scalar_lea.vmem [#allocation7], %s613_s7  ;;  %s1099_s4 = scalar_lea.vmem [#allocation8], %s613_s7 }
  0x54   : > { %276 = vst [vmem:[%s1096_s9] sm:$0xff] %v925_v0  ;;  %277 = vst [vmem:[%s1099_s4] sm:$0xff] %v925_v0  ;;  %p281_p2 = scmp.gt.s32.totalorder %s280_s8, 0  ;;  %p616_p9 = scmp.lt.s32.totalorder %s280_s8, 32 }
  0x56   : > { %s1286_s8 = smov (!%p281_p2, %s280_s8), 0 }
  0x57   : > { %s1288_s8 = smov (!%p616_p9, %s1286_s8), 32 }
  0x58   : > { %p621_p12 = scmp.ne.s32.totalorder %s1288_s8, 32 }
  0x5a   : > { %288 = sbr.rel (%p621_p12) target bundleno = 126 (0x7e), region = 44 }
  0x5f   : > { %v289_v1 = vld [vmem:[%s1079_s30] sm:$0xff]  ;;  %v290_v2 = vld [vmem:[%s1085_s6] sm:$0xff]  ;;  %v926_v4 = vmov 0  }
  0x60   : > { %vm291_vm0 = vnez %v289_v1  ;;  %v292_v3 = vor.u32 %v290_v2, %v289_v1  ;;  %v366_v45 = vld [vmem:[%s1096_s9] sm:$0xff]  ;;  %v369_v62 = vld [vmem:[%s1099_s4] sm:$0xff] }
  0x61   : > { %v294_v5 = vsel %vm291_vm0, 16843009, %v926_v4 }
  0x62   : > { %v295_v6 = vunpack.c.0.s8 %v294_v5  ;;  %v296_v7 = vunpack.c.1.s8 %v294_v5  ;;  %v297_v8 = vunpack.c.2.s8 %v294_v5  ;;  %v298_v9 = vunpack.c.3.s8 %v294_v5 }
  0x63   : > { %vm293_vm1 = vnez %v292_v3 }
  0x64   : > { %v299_v10 = vpack.c.b16 %v295_v6, %v295_v6  ;;  %v301_v11 = vpack.c.b16 %v296_v7, %v296_v7  ;;  %v303_v12 = vpack.c.b16 %v297_v8, %v297_v8  ;;  %v305_v13 = vpack.c.b16 %v298_v9, %v298_v9 }
  0x65   : > { %v327_v14 = vsel %vm293_vm1, 16843009, %v926_v4 }
  0x66   : > { %v300_v15 = vpack.c.b8 %v299_v10, %v299_v10  ;;  %v302_v16 = vpack.c.b8 %v301_v11, %v301_v11  ;;  %v304_v17 = vpack.c.b8 %v303_v12, %v303_v12  ;;  %v306_v18 = vpack.c.b8 %v305_v13, %v305_v13 }
  0x67   : > { %v328_v19 = vunpack.c.0.s8 %v327_v14  ;;  %v329_v20 = vunpack.c.1.s8 %v327_v14  ;;  %v330_v21 = vunpack.c.2.s8 %v327_v14  ;;  %v331_v22 = vunpack.c.3.s8 %v327_v14 }
  0x68   : > { %vm307_vm2 = vnez %v300_v15  ;;  %vm308_vm3 = vnez %v302_v16  ;;  %vm309_vm4 = vnez %v304_v17  ;;  %vm310_vm5 = vnez %v306_v18 }
  0x69   : > { %v311_v23 = vsel %vm307_vm2, 16843009, %v926_v4  ;;  %v312_v24 = vsel %vm308_vm3, 16843009, %v926_v4  ;;  %v313_v25 = vsel %vm309_vm4, 16843009, %v926_v4  ;;  %v332_v26 = vpack.c.b16 %v328_v19, %v328_v19 }
  0x6a   : > { %v314_v27 = vsel %vm310_vm5, 16843009, %v926_v4  ;;  %v315_v28 = vunpack.c.0.s8 %v311_v23  ;;  %v316_v29 = vunpack.c.0.s8 %v312_v24  ;;  %v317_v30 = vunpack.c.0.s8 %v313_v25 }
  0x6b   : > { %v318_v31 = vunpack.c.0.s8 %v314_v27  ;;  %v333_v32 = vpack.c.b8 %v332_v26, %v332_v26  ;;  %v334_v33 = vpack.c.b16 %v329_v20, %v329_v20  ;;  %v336_v34 = vpack.c.b16 %v330_v21, %v330_v21 }
  0x6c   : > { %vm319_vm6 = vcmp.ne.s32.totalorder %v315_v28, 0  ;;  %vm320_vm7 = vcmp.ne.s32.totalorder %v316_v29, 0  ;;  %vm321_vm8 = vcmp.ne.s32.totalorder %v317_v30, 0  ;;  %v338_v35 = vpack.c.b16 %v331_v22, %v331_v22 }
  0x6d   : > { %vm322_vm9 = vcmp.ne.s32.totalorder %v318_v31, 0  ;;  %v323_v36 = vsel %vm319_vm6, 1, %v926_v4  ;;  %v324_v37 = vsel %vm320_vm7, 1, %v926_v4  ;;  %v325_v38 = vsel %vm321_vm8, 1, %v926_v4 }
  0x6e   : > { %v326_v39 = vsel %vm322_vm9, 1, %v926_v4  ;;  %v360_v40 = vadd.s32 %v324_v37, %v323_v36  ;;  %v335_v41 = vpack.c.b8 %v334_v33, %v334_v33  ;;  %v337_v42 = vpack.c.b8 %v336_v34, %v336_v34 }
  0x6f   : > { %v361_v43 = vadd.s32 %v326_v39, %v325_v38  ;;  %v339_v44 = vpack.c.b8 %v338_v35, %v338_v35  ;;  %vm340_vm10 = vnez %v333_v32 }
  0x70   : > { %vm341_vm11 = vnez %v335_v41  ;;  %vm342_vm12 = vnez %v337_v42  ;;  %v344_v46 = vsel %vm340_vm10, 16843009, %v926_v4 }
  0x71   : > { %v362_v47 = vadd.s32 %v361_v43, %v360_v40  ;;  %vm343_vm13 = vnez %v339_v44  ;;  %v345_v48 = vsel %vm341_vm11, 16843009, %v926_v4  ;;  %v346_v49 = vsel %vm342_vm12, 16843009, %v926_v4 }
  0x72   : > { %v347_v50 = vsel %vm343_vm13, 16843009, %v926_v4  ;;  %v348_v51 = vunpack.c.0.s8 %v344_v46  ;;  %v349_v52 = vunpack.c.0.s8 %v345_v48  ;;  %v350_v53 = vunpack.c.0.s8 %v346_v49 }
  0x73   : > { %v367_v54 = vadd.s32 %v366_v45, %v362_v47  ;;  %v351_v55 = vunpack.c.0.s8 %v347_v50 }
  0x74   : > { %vm352_vm14 = vcmp.ne.s32.totalorder %v348_v51, 0  ;;  %vm353_vm15 = vcmp.ne.s32.totalorder %v349_v52, 0  ;;  %vm354_vm0 = vcmp.ne.s32.totalorder %v350_v53, 0 }
  0x75   : > { %368 = vst [vmem:[%s1096_s9] sm:$0xff] %v367_v54  ;;  %vm355_vm1 = vcmp.ne.s32.totalorder %v351_v55, 0  ;;  %v356_v56 = vsel %vm352_vm14, 1, %v926_v4  ;;  %v357_v57 = vsel %vm353_vm15, 1, %v926_v4  ;;  %v358_v58 = vsel %vm354_vm0, 1, %v926_v4 }
  0x76   : > { %v359_v59 = vsel %vm355_vm1, 1, %v926_v4  ;;  %v363_v60 = vadd.s32 %v357_v57, %v356_v56 }
  0x77   : > { %v364_v61 = vadd.s32 %v359_v59, %v358_v58 }
  0x79   : > { %v365_v63 = vadd.s32 %v364_v61, %v363_v60 }
  0x7b   : > { %v370_v0 = vadd.s32 %v369_v62, %v365_v63 }
  0x7d   : > { %371 = vst [vmem:[%s1099_s4] sm:$0xff] %v370_v0 }
  0x7e PF: > { %p622_p13 = scmp.ge.s32.totalorder %s1288_s8, 32 }
  0x80   : > { %375 = sbr.rel (%p622_p13) target bundleno = 154 (0x9a), region = 48 }
  0x85   : > { %v376_v1 = vld [vmem:[%s1079_s30] sm:$0xff]  ;;  %v386_v2 = vlaneseq  ;;  %v396_v3 = vstv %s1288_s8  ;;  %v377_v5 = vld [vmem:[%s1085_s6] sm:$0xff]  ;;  %v927_v21 = vmov 0  }
  0x86   : > { %v378_v6 = vunpack.c.0.s8 %v376_v1  ;;  %v379_v7 = vunpack.c.1.s8 %v376_v1  ;;  %v380_v4 = vunpack.c.2.s8 %v376_v1  ;;  %v381_v8 = vunpack.c.3.s8 %v376_v1  ;;  %v431_v32 = vld [vmem:[%s1096_s9] sm:$0xff]  ;;  %v434_v39 = vld [vmem:[%s1099_s4] sm:$0xff] }
  0x87   : > { %v387_v9 = vshrl.u32 %v386_v2, 7  ;;  %v382_v10 = vunpack.c.0.s8 %v377_v5  ;;  %v383_v12 = vunpack.c.1.s8 %v377_v5  ;;  %v384_v13 = vunpack.c.2.s8 %v377_v5 }
  0x88   : > { %vm401_vm2 = vcmp.ne.s32.totalorder %v378_v6, 0  ;;  %vm1133_vm3 = vcmp.ne.s32.totalorder %v379_v7, 0  ;;  %vm403_vm5 = vcmp.ne.s32.totalorder %v380_v4, 0  ;;  %vm1137_vm6 = vcmp.ne.s32.totalorder %v381_v8, 0 }
  0x89   : > { %v388_v14 = vadd.s32 8, %v387_v9  ;;  %v389_v15 = vadd.s32 16, %v387_v9  ;;  %v390_v16 = vadd.s32 24, %v387_v9  ;;  %vm397_vm4 = vcmp.ge.s32.totalorder %v387_v9, %v396_v3 }
  0x8a   : > { %vm1141_vm7 = vmor %vm401_vm2, %vm397_vm4  ;;  %v385_v19 = vunpack.c.3.s8 %v377_v5  ;;  %vm1145_vm8 = vcmp.ne.s32.totalorder %v382_v10, 0  ;;  %vm410_vm14 = vcmp.ne.s32.totalorder %v383_v12, 0  ;;  %vm411_vm0 = vcmp.ne.s32.totalorder %v384_v13, 0 }
  0x8b   : > { %vm398_vm9 = vcmp.ge.s32.totalorder %v388_v14, %v396_v3  ;;  %vm399_vm10 = vcmp.ge.s32.totalorder %v389_v15, %v396_v3  ;;  %vm400_vm11 = vcmp.ge.s32.totalorder %v390_v16, %v396_v3  ;;  %v417_v22 = vsel %vm1141_vm7, 1, %v927_v21  ;;  %vm413_vm12 = vmor %vm1141_vm7, %vm1145_vm8 }
  0x8c   : > { %vm406_vm13 = vmor %vm1133_vm3, %vm398_vm9  ;;  %vm412_vm2 = vcmp.ne.s32.totalorder %v385_v19, 0  ;;  %v421_v28 = vsel %vm413_vm12, 1, %v927_v21 }
  0x8d   : > { %vm1157_vm15 = vmor %vm403_vm5, %vm399_vm10  ;;  %v418_v24 = vsel %vm406_vm13, 1, %v927_v21 }
  0x8e   : > { %vm1163_vm1 = vmor %vm1137_vm6, %vm400_vm11  ;;  %v419_v26 = vsel %vm1157_vm15, 1, %v927_v21  ;;  %v425_v27 = vadd.s32 %v418_v24, %v417_v22 }
  0x8f   : > { %v420_v29 = vsel %vm1163_vm1, 1, %v927_v21  ;;  %vm414_vm3 = vmor %vm406_vm13, %vm410_vm14 }
  0x90   : > { %v426_v30 = vadd.s32 %v420_v29, %v419_v26  ;;  %vm415_vm4 = vmor %vm1157_vm15, %vm411_vm0  ;;  %v422_v31 = vsel %vm414_vm3, 1, %v927_v21 }
  0x91   : > { %vm416_vm5 = vmor %vm1163_vm1, %vm412_vm2  ;;  %v423_v33 = vsel %vm415_vm4, 1, %v927_v21  ;;  %v428_v34 = vadd.s32 %v422_v31, %v421_v28 }
  0x92   : > { %v427_v35 = vadd.s32 %v426_v30, %v425_v27  ;;  %v424_v36 = vsel %vm416_vm5, 1, %v927_v21 }
  0x93   : > { %v429_v37 = vadd.s32 %v424_v36, %v423_v33 }
  0x94   : > { %v432_v38 = vadd.s32 %v431_v32, %v427_v35 }
  0x95   : > { %v430_v40 = vadd.s32 %v429_v37, %v428_v34 }
  0x96   : > { %433 = vst [vmem:[%s1096_s9] sm:$0xff] %v432_v38 }
  0x97   : > { %v435_v41 = vadd.s32 %v434_v39, %v430_v40 }
  0x99   : > { %436 = vst [vmem:[%s1099_s4] sm:$0xff] %v435_v41 }
  0x9a PF: > { %s625_s24 = sshll.u32 %s913_s17, 7  ;;  %s456_s20 = sshll.u32 %s1096_s9, 4  ;;  %s457_s20 = int_to_ptr.vmem [resolvable:$true] %s456_s20 }
  0x9b   : > { %s454_s15 = scalar_lea.hbm %s1248_s2, %s625_s24  ;;  %s438_s21 = scalar_lea.sflag [#allocation4], %s1092_s23 }
  0x9c   : > { %s786_s25 = scalar_lea.vmem %s457_s20, 128  ;;  %p1274_p3 = scmp.ne.s32.totalorder %s1254_s28, 0 }
  0x9d   : > { %p787_p0 = scmp.ne.s32.totalorder %s457_s20, %s786_s25  ;;  %s928_s30 = smov [#allocation7]  }
  0x9e   : > { %s790_s5 = sshll.u32 %s928_s30, 4  ;;  %s791_s5 = int_to_ptr.vmem [resolvable:$false] %s790_s5 }
  0x9f   : > { %p788_p5 = pnand %p787_p0, %p1274_p3  ;;  %s792_s6 = scalar_lea.vmem %s791_s5, 256 }
  0xa0   : > { %p793_p11 = scmp.lt.s32.totalorder %s457_s20, %s791_s5  ;;  %p794_p1 = scmp.lt.s32.totalorder %s792_s6, %s786_s25 }
  0xa1   : > { %p789_p10 = pneg %p788_p5 }
  0xa2   : > { %p795_p7 = por %p794_p1, %p793_p11 }
  0xa4   : > { %p796_p4 = pnand %p795_p7, %p789_p10 }
  0xa6   : > { %799 = shalt.err (!%p796_p4)
}
  0xa7   : > { %s800_s26 = scalar_lea.hbm %s454_s15, 128  ;;  %s804_s9 = scalar_lea.hbm %s1248_s2, 256 }
  0xa8   : > { %p801_p6 = scmp.ne.s32.totalorder %s454_s15, %s800_s26  ;;  %p805_p9 = scmp.lt.s32.totalorder %s454_s15, %s1248_s2 }
  0xa9   : > { %p806_p12 = scmp.lt.s32.totalorder %s804_s9, %s800_s26 }
  0xaa   : > { %p802_p8 = pnand %p801_p6, %p1274_p3 }
  0xab   : > { %p807_p13 = por %p806_p12, %p805_p9 }
  0xac   : > { %p803_p2 = pneg %p802_p8 }
  0xae   : > { %p808_p0 = pnand %p807_p13, %p803_p2 }
  0xb0   : > { %811 = shalt.err (!%p808_p0)
}
  0xb1   : > { %635 = dma.vmem_to_hbm [thread:$0]  (%p1274_p3), %s457_s20, 128, %s454_s15, %s438_s21  }
  0xb2   : > { %s467_s5 = scalar_lea.hbm %s1249_s3, %s625_s24  ;;  %s469_s6 = sshll.u32 %s1099_s4, 4  ;;  %s470_s6 = int_to_ptr.vmem [resolvable:$true] %s469_s6 }
  0xb3   : > { %s443_s7 = scalar_lea.sflag [#allocation9], %s1092_s23  ;;  %s812_s8 = scalar_lea.vmem %s470_s6, 128 }
  0xb4   : > { %p813_p5 = scmp.ne.s32.totalorder %s470_s6, %s812_s8  ;;  %s929_s26 = smov [#allocation8]  }
  0xb5   : > { %s816_s9 = sshll.u32 %s929_s26, 4  ;;  %s817_s9 = int_to_ptr.vmem [resolvable:$false] %s816_s9 }
  0xb6   : > { %p814_p10 = pnand %p813_p5, %p1274_p3  ;;  %s818_s10 = scalar_lea.vmem %s817_s9, 256 }
  0xb7   : > { %p819_p1 = scmp.lt.s32.totalorder %s470_s6, %s817_s9  ;;  %p820_p7 = scmp.lt.s32.totalorder %s818_s10, %s812_s8 }
  0xb8   : > { %p815_p11 = pneg %p814_p10 }
  0xb9   : > { %p821_p4 = por %p820_p7, %p819_p1 }
  0xbb   : > { %p822_p6 = pnand %p821_p4, %p815_p11 }
  0xbd   : > { %825 = shalt.err (!%p822_p6)
}
  0xbe   : > { %s826_s17 = scalar_lea.hbm %s467_s5, 128  ;;  %s830_s24 = scalar_lea.hbm %s1249_s3, 256 }
  0xbf   : > { %p827_p8 = scmp.ne.s32.totalorder %s467_s5, %s826_s17  ;;  %p831_p12 = scmp.lt.s32.totalorder %s467_s5, %s1249_s3 }
  0xc0   : > { %p832_p13 = scmp.lt.s32.totalorder %s830_s24, %s826_s17 }
  0xc1   : > { %p828_p2 = pnand %p827_p8, %p1274_p3 }
  0xc2   : > { %p833_p0 = por %p832_p13, %p831_p12 }
  0xc3   : > { %p829_p9 = pneg %p828_p2 }
  0xc5   : > { %p834_p5 = pnand %p833_p0, %p829_p9 }
  0xc7   : > { %837 = shalt.err (!%p834_p5)
}
  0xc8   : > { %636 = dma.vmem_to_hbm [thread:$0]  (%p1274_p3), %s470_s6, 128, %s467_s5, %s443_s7  }
  0xc9 PF: > { %s481_s21 = sand.u32 1, %s893_s12   ;;  %p1275_p10 = scmp.ne.s32.totalorder %s1255_s29, 0 }
  0xca   : > { %p1276_p11 = scmp.ge.s32.totalorder %s921_s19, 2  ;;  %s482_s11 = scalar_lea.sflag [#allocation4], %s481_s21 }
  0xcc   : > { %p647_p1 = pnand %p1276_p11, %p1275_p10 }
  0xce   : > { %p648_p7 = pneg %p647_p1 }
  0xd0   : > { %883 = dma.done.wait (%p648_p7), %s482_s11, 128  }
  0xd1   : > { %885 = vsyncadd (%p648_p7), %s482_s11, 4294967168  ;;  %s491_s25 = scalar_lea.sflag [#allocation9], %s481_s21 }
  0xd2   : > { %887 = dma.done.wait (%p648_p7), %s491_s25, 128  }
  0xd3   : > { %889 = vsyncadd (%p648_p7), %s491_s25, 4294967168  ;;  %s26_s19 = sadd.s32 1, %s921_s19   ;;  %s1277_s12 = smov %s897_s13 }
  0xd4   : > { %p23_p4 = scmp.ge.s32.totalorder %s26_s19, 4   ;;  %s1278_s13 = smov %s901_s14 }
  0xd5   : > { %s1279_s14 = smov %s1008_s27  ;;  %s1280_s15 = smov %s909_s16 }
  0xd6   : > { %s1236_s16 = smov 0   ;;  %s1281_s17 = smov %s917_s18 }
  0xd7   : > { %s1282_s18 = smov %s1284_s22  ;;  %25 = sbr.rel (!%p23_p4) target bundleno = 11 (0xb), region = 115 }
  0xdc   :  { %496 = vsyncpa [#allocation3], 1 }
  0xdd   :  { %498 = vsyncpa [#allocation3 + $0x1], 1 }
  0xde   :  { %499 = vsyncpa [#allocation6], 1 }
  0xdf   :  { %501 = vsyncpa [#allocation6 + $0x1], 1 }
  0xe0   :  { %502 = vsyncpa [#allocation4], 1 }
  0xe1   :  { %504 = vsyncpa [#allocation4 + $0x1], 1 }
  0xe2   :  { %505 = vsyncpa [#allocation9], 1 }
  0xe3   :  { %507 = vsyncpa [#allocation9 + $0x1], 1 }

</bundles_post_ra>
